<compile_context>
chip_gen: v7x
topology: tpu7x:2x2x1
jax: 0.10.0
libtpu: 0.0.40
codegen_flags: <defaults>
</compile_context>

<pallas_src>
import jax
import jax.numpy as jnp
import numpy as np
from jax.experimental import pallas as pl
from jax.experimental.pallas import tpu as pltpu

# ---------------- configuration (small synthetic sizes) ----------------
B = 4
LOCAL_FEATURES = [0, 1, 2, 3]            # channel indices of local features
GLOBAL_FEATURES = [4, 5]                 # channel indices of global features
C_LOC = len(LOCAL_FEATURES)
N_GLOB = len(GLOBAL_FEATURES)
C_TOTAL = C_LOC + N_GLOB
SEQ_LEN = 69                             # forced by hard-coded cdr index ranges
CNN_CHANNELS = 16
KSIZE = 3
DENSE_NEURONS = 32
EPS = 1e-5

# segment index ranges, in forward()'s concatenation order:
# pep, cdr1a, cdr2a, cdr3a, cdr1b, cdr2b, cdr3b
SEG_STARTS = [0, 9, 16, 24, 39, 45, 52]
SEG_LENS   = [9, 7,  8, 15,  6,  7, 17]
N_SEG = len(SEG_LENS)

K_PATCH = KSIZE * C_LOC                  # 12 (per-segment im2col width)
N_CONV = N_SEG * CNN_CHANNELS            # 112 (valid fused conv channels)
N_FEAT = N_CONV + N_GLOB                 # 114 (dense1 input width)

POS_PAD = 72                             # 69 -> 72  (sublane-aligned positions)
K_PAD = 128                              # 84 -> 128 (lane-dense contraction)
N_PAD = 128                              # 112 -> 128 (lane-dense conv outputs)
N_GROUPS = K_PAD // C_LOC                # 32 four-channel tap groups (21 valid)
NEG = -1e30                              # additive mask value for the pooled max


# -------------------- trace-time constant tables (numpy) --------------------
def _build_im2col_tables():
    pos_idx = np.zeros((POS_PAD, N_GROUPS), np.int32)
    valid = np.zeros((POS_PAD, N_GROUPS), np.float32)
    for s, (start, L) in enumerate(zip(SEG_STARTS, SEG_LENS)):
        for t in range(start, start + L):
            for k in range(KSIZE):
                src = t - 1 + k                    # 'same' conv tap position
                g = s * KSIZE + k                  # 4-wide column group index
                if start <= src < start + L:       # zero-pad at segment edges
                    pos_idx[t, g] = src
                    valid[t, g] = 1.0
    return pos_idx, valid


def _build_channel_bounds():
    lo = np.zeros((N_PAD,), np.float32)            # padded channels: lo=hi=0 -> never inside
    hi = np.zeros((N_PAD,), np.float32)
    for s, (start, L) in enumerate(zip(SEG_STARTS, SEG_LENS)):
        lo[s * CNN_CHANNELS:(s + 1) * CNN_CHANNELS] = float(start)
        hi[s * CNN_CHANNELS:(s + 1) * CNN_CHANNELS] = float(start + L)
    return lo, hi


POS_IDX_NP, VALID_NP = _build_im2col_tables()
CH_LO_NP, CH_HI_NP = _build_channel_bounds()


# ---------------------------- Pallas kernel ----------------------------
def _sigmoid(x):
    # single EUP op per element; exact sigmoid rewrite for f32
    return 0.5 * jnp.tanh(0.5 * x) + 0.5


def _make_kernel(bsz):
    def kernel(patch_ref, wall_ref, pack_ref, glob_ref, out_ref):
        # static sublane slices of the stacked weight buffer (free ref views)
        w_conv = wall_ref[0:K_PAD, :]                    # (128, 128) block-diag conv weight
        w_d1 = wall_ref[K_PAD:K_PAD + N_PAD, :]          # (128, 128) BN-folded dense1 weight

        # fused 'same' conv for all 7 segments: one 2-D MXU matmul, M=B*72
        conv = jnp.dot(patch_ref[...], w_conv,
                       preferred_element_type=jnp.float32)          # (B*72, 128)
        conv3 = conv.reshape(bsz, POS_PAD, N_PAD)                    # tile-aligned split

        # in-kernel segment mask: 0 inside a channel's own segment rows, -1e30 outside
        row = jax.lax.broadcasted_iota(
            jnp.int32, (POS_PAD, N_PAD), 0).astype(jnp.float32)
        lo = pack_ref[6:7, :]
        hi = pack_ref[7:8, :]
        mask = jnp.where((row >= lo) & (row < hi), 0.0, NEG)         # (72, 128)

        # AdaptiveMaxPool1d(1): masked max over positions
        pooled = jnp.max(conv3 + mask[None, :, :], axis=1)           # (B, 128)

        # conv bias + sigmoid AFTER the pool (exact: sigmoid monotone, bias const)
        a = _sigmoid(pooled + pack_ref[0:1, :])                      # (B, 128)

        # global features via two VPU broadcast-FMAs (no K=2 MXU pass)
        gcontrib = (glob_ref[:, 0:1] * pack_ref[3:4, :]
                    + glob_ref[:, 1:2] * pack_ref[4:5, :])           # (B, 128)

        # dense1 (bn_dense folded); padded columns give sigmoid(0)=0.5 * zero w2 -> 0
        h = _sigmoid(jnp.dot(a, w_d1, preferred_element_type=jnp.float32)
                     + gcontrib + pack_ref[1:2, :])                  # (B, 128)

        # dense_out: elementwise mul + lane reduce instead of a K=32,N=1 matmul
        y = jnp.sum(h * pack_ref[2:3, :], axis=-1, keepdims=True) + pack_ref[5:6, 0:1]
        out_ref[...] = _sigmoid(y)                                   # (B, 1)

    return kernel


# ------------------------------ wrapper --------------------------------
@jax.jit
def cdr_cnn_forward(x, p):
    x = x.astype(jnp.float32)
    bsz = x.shape[0]
    glob = x[:, jnp.asarray(GLOBAL_FEATURES), 0]                          # (B, 2)
    xl = jnp.transpose(x[:, jnp.asarray(LOCAL_FEATURES), :], (0, 2, 1))   # (B, 69, 4)

    # fold bn_start (eval) into the input scaling
    scale0 = p['bn0_gamma'] / jnp.sqrt(p['bn0_rv'] + EPS)
    shift0 = p['bn0_beta'] - p['bn0_rm'] * scale0
    xn = xl * scale0[None, None, :] + shift0[None, None, :]              # (B, 69, 4)

    # single-gather im2col: constant index table + boundary-zero validity mask
    gathered = jnp.take(xn, jnp.asarray(POS_IDX_NP), axis=1)             # (B, 72, 32, 4)
    patches = (gathered * jnp.asarray(VALID_NP)[None, :, :, None]
               ).reshape(bsz, POS_PAD, K_PAD)
    patches2d = patches.reshape(bsz * POS_PAD, K_PAD)                    # (B*72, 128)

    # block-diagonal fused conv weight (128, 128); row inside block s = k*4 + c
    wbd = jnp.zeros((K_PAD, N_PAD), jnp.float32)
    for s in range(N_SEG):
        ws = jnp.transpose(p['conv_w'][s], (2, 1, 0)).reshape(K_PATCH, CNN_CHANNELS)
        wbd = wbd.at[s * K_PATCH:(s + 1) * K_PATCH,
                     s * CNN_CHANNELS:(s + 1) * CNN_CHANNELS].set(ws)

    # fold bn_dense (eval) into dense1; split pooled / global parts
    dscale = p['bnd_gamma'] / jnp.sqrt(p['bnd_rv'] + EPS)
    dshift = p['bnd_beta'] - p['bnd_rm'] * dscale
    w1t = p['w1'].T                                                      # (114, 32)
    w1a = dscale[:N_CONV, None] * w1t[:N_CONV, :]                        # (112, 32)
    w1g = dscale[N_CONV:, None] * w1t[N_CONV:, :]                        # (2, 32)
    b1 = p['b1'] + dshift @ w1t                                          # (32,)

    w_d1 = jnp.zeros((N_PAD, N_PAD), jnp.float32).at[:N_CONV, :DENSE_NEURONS].set(w1a)
    wall = jnp.concatenate([wbd, w_d1], axis=0)                          # (256, 128)

    def pad_row(v):
        return jnp.zeros((N_PAD,), jnp.float32).at[:v.shape[0]].set(v)

    pack = jnp.stack([
        pad_row(p['conv_b'].reshape(N_CONV)),            # 0: conv bias (112 valid)
        pad_row(b1),                                     # 1: dense1 bias (BN folded)
        pad_row(p['w2'].reshape(DENSE_NEURONS)),         # 2: dense_out weight row
        pad_row(w1g[0]),                                 # 3: global-feature-0 dense1 row
        pad_row(w1g[1]),                                 # 4: global-feature-1 dense1 row
        pad_row(p['b2'].reshape(1)),                     # 5: dense_out bias (lane 0)
        jnp.asarray(CH_LO_NP),                           # 6: per-channel segment start
        jnp.asarray(CH_HI_NP),                           # 7: per-channel segment end
    ], axis=0)                                           # (8, 128)

    return pl.pallas_call(
        _make_kernel(bsz),
        out_shape=jax.ShapeDtypeStruct((bsz, 1), jnp.float32),
        in_specs=[pl.BlockSpec(memory_space=pltpu.MemorySpace.VMEM)] * 4,
        out_specs=pl.BlockSpec(memory_space=pltpu.MemorySpace.VMEM),
    )(patches2d, wall, pack, glob)


# -------------------- pure-JAX reference (mirror of PyTorch) --------------------
def reference_forward(x, p):
    x = x.astype(jnp.float32)
    glob = x[:, jnp.asarray(GLOBAL_FEATURES), 0]
    xl = x[:, jnp.asarray(LOCAL_FEATURES), :]                    # (B, C, 69)
    scale = p['bn0_gamma'] / jnp.sqrt(p['bn0_rv'] + EPS)
    xn = (xl - p['bn0_rm'][None, :, None]) * scale[None, :, None] + p['bn0_beta'][None, :, None]
    feats = []
    for s, (start, L) in enumerate(zip(SEG_STARTS, SEG_LENS)):
        seg = xn[:, :, start:start + L]
        segp = jnp.pad(seg, ((0, 0), (0, 0), (1, 1)))
        W = p['conv_w'][s]                                       # (O, C, 3)
        out = jnp.zeros((x.shape[0], CNN_CHANNELS, L), jnp.float32)
        for k in range(KSIZE):
            out = out + jnp.einsum('oc,bct->bot', W[:, :, k], segp[:, :, k:k + L])
        out = out + p['conv_b'][s][None, :, None]
        act = jax.nn.sigmoid(out)
        feats.append(jnp.max(act, axis=2))
    f = jnp.concatenate(feats + [glob], axis=1)
    dscale = p['bnd_gamma'] / jnp.sqrt(p['bnd_rv'] + EPS)
    fbn = (f - p['bnd_rm'][None, :]) * dscale[None, :] + p['bnd_beta'][None, :]
    h = jax.nn.sigmoid(fbn @ p['w1'].T + p['b1'][None, :])
    return jax.nn.sigmoid(h @ p['w2'].T + p['b2'][None, :])


# --------------------------- deterministic params ---------------------------
def init_params(key):
    ks = jax.random.split(key, 14)
    a_c = float(np.sqrt(6.0 / (C_LOC * KSIZE)))
    a_1 = float(np.sqrt(6.0 / N_FEAT))
    a_2 = float(np.sqrt(6.0 / DENSE_NEURONS))
    return {
        'conv_w': jax.random.uniform(ks[0], (N_SEG, CNN_CHANNELS, C_LOC, KSIZE),
                                     minval=-a_c, maxval=a_c),
        'conv_b': jax.random.uniform(ks[1], (N_SEG, CNN_CHANNELS), minval=-0.1, maxval=0.1),
        'bn0_gamma': jax.random.uniform(ks[2], (C_LOC,), minval=0.5, maxval=1.5),
        'bn0_beta':  jax.random.uniform(ks[3], (C_LOC,), minval=-0.2, maxval=0.2),
        'bn0_rm':    jax.random.normal(ks[4], (C_LOC,)) * 0.1,
        'bn0_rv':    jax.random.uniform(ks[5], (C_LOC,), minval=0.5, maxval=1.5),
        'bnd_gamma': jax.random.uniform(ks[6], (N_FEAT,), minval=0.5, maxval=1.5),
        'bnd_beta':  jax.random.uniform(ks[7], (N_FEAT,), minval=-0.2, maxval=0.2),
        'bnd_rm':    jax.random.normal(ks[8], (N_FEAT,)) * 0.1,
        'bnd_rv':    jax.random.uniform(ks[9], (N_FEAT,), minval=0.5, maxval=1.5),
        'w1': jax.random.uniform(ks[10], (DENSE_NEURONS, N_FEAT), minval=-a_1, maxval=a_1),
        'b1': jax.random.uniform(ks[11], (DENSE_NEURONS,), minval=-0.1, maxval=0.1),
        'w2': jax.random.uniform(ks[12], (1, DENSE_NEURONS), minval=-a_2, maxval=a_2),
        'b2': jax.random.uniform(ks[13], (1,), minval=-0.1, maxval=0.1),
    }


if __name__ == "__main__":
    key = jax.random.PRNGKey(0)
    kx, kp = jax.random.split(key)
    params = init_params(kp)
    x = jax.random.normal(kx, (B, C_TOTAL, SEQ_LEN), dtype=jnp.float32)

    out = jax.block_until_ready(cdr_cnn_forward(x, params))
    ref = jax.block_until_ready(reference_forward(x, params))

    assert out.shape == (B, 1)
    np.testing.assert_allclose(np.asarray(out), np.asarray(ref), rtol=1e-4, atol=1e-5)
    print("KERNEL_OK")
</pallas_src>

<mosaic_0001>
module attributes {stable_mosaic.version = 11 : i64} {
  func.func @kernel(%arg0: memref<288x128xf32, #tpu.memory_space<vmem>>, %arg1: memref<256x128xf32, #tpu.memory_space<vmem>>, %arg2: memref<8x128xf32, #tpu.memory_space<vmem>>, %arg3: memref<4x2xf32, #tpu.memory_space<vmem>>, %arg4: memref<4x1xf32, #tpu.memory_space<vmem>>) attributes {dimension_semantics = [], scalar_prefetch = 0 : i64, scratch_operands = 0 : i64, tpu.core_type = #tpu.core_type<tc>} {
    %c0 = arith.constant 0 : index
    %c0_0 = arith.constant 0 : index
    %0 = vector.load %arg1[%c0, %c0_0] : memref<256x128xf32, #tpu.memory_space<vmem>>, vector<128x128xf32>
    %c128 = arith.constant 128 : index
    %c0_1 = arith.constant 0 : index
    %1 = vector.load %arg1[%c128, %c0_1] : memref<256x128xf32, #tpu.memory_space<vmem>>, vector<128x128xf32>
    %c0_2 = arith.constant 0 : index
    %c0_3 = arith.constant 0 : index
    %2 = vector.load %arg0[%c0_2, %c0_3] : memref<288x128xf32, #tpu.memory_space<vmem>>, vector<288x128xf32>
    %cst = arith.constant dense<0.000000e+00> : vector<288x128xf32>
    %3 = tpu.matmul %2, %0, %cst {dimension_numbers = #tpu.dot_dimension_numbers<[1], [0], [0], [1], [0, 0, 1, 1], [], []>} : vector<288x128xf32>, vector<128x128xf32>, vector<288x128xf32> -> vector<288x128xf32>
    %4 = vector.shape_cast %3 : vector<288x128xf32> to vector<4x72x128xf32>
    %5 = tpu.iota {dimensions = array<i32: 0>} : vector<72x128xi32>
    %6 = arith.sitofp %5 : vector<72x128xi32> to vector<72x128xf32>
    %c6 = arith.constant 6 : index
    %c0_4 = arith.constant 0 : index
    %7 = vector.load %arg2[%c6, %c0_4] : memref<8x128xf32, #tpu.memory_space<vmem>>, vector<1x128xf32>
    %c7 = arith.constant 7 : index
    %c0_5 = arith.constant 0 : index
    %8 = vector.load %arg2[%c7, %c0_5] : memref<8x128xf32, #tpu.memory_space<vmem>>, vector<1x128xf32>
    %9 = vector.broadcast %7 : vector<1x128xf32> to vector<72x128xf32>
    %10 = arith.cmpf oge, %6, %9 : vector<72x128xf32>
    %11 = vector.broadcast %8 : vector<1x128xf32> to vector<72x128xf32>
    %12 = arith.cmpf olt, %6, %11 : vector<72x128xf32>
    %13 = arith.andi %10, %12 : vector<72x128xi1>
    %cst_6 = arith.constant 0.000000e+00 : f32
    %cst_7 = arith.constant -1.000000e+30 : f32
    %14 = vector.broadcast %cst_6 : f32 to vector<72x128xf32>
    %15 = vector.broadcast %cst_7 : f32 to vector<72x128xf32>
    %16 = arith.select %13, %14, %15 : vector<72x128xi1>, vector<72x128xf32>
    %17 = vector.shape_cast %16 : vector<72x128xf32> to vector<1x72x128xf32>
    %18 = vector.broadcast %17 : vector<1x72x128xf32> to vector<4x72x128xf32>
    %19 = arith.addf %4, %18 : vector<4x72x128xf32>
    %cst_8 = arith.constant dense<0xFF800000> : vector<4x128xf32>
    %20 = vector.multi_reduction <maximumf>, %19, %cst_8 [1] : vector<4x72x128xf32> to vector<4x128xf32>
    %c0_9 = arith.constant 0 : index
    %c0_10 = arith.constant 0 : index
    %21 = vector.load %arg2[%c0_9, %c0_10] : memref<8x128xf32, #tpu.memory_space<vmem>>, vector<1x128xf32>
    %22 = vector.broadcast %21 : vector<1x128xf32> to vector<4x128xf32>
    %23 = arith.addf %20, %22 : vector<4x128xf32>
    %cst_11 = arith.constant 5.000000e-01 : f32
    %24 = vector.broadcast %cst_11 : f32 to vector<4x128xf32>
    %25 = arith.mulf %24, %23 : vector<4x128xf32>
    %26 = math.tanh %25 : vector<4x128xf32>
    %cst_12 = arith.constant 5.000000e-01 : f32
    %27 = vector.broadcast %cst_12 : f32 to vector<4x128xf32>
    %28 = arith.mulf %27, %26 : vector<4x128xf32>
    %cst_13 = arith.constant 5.000000e-01 : f32
    %29 = vector.broadcast %cst_13 : f32 to vector<4x128xf32>
    %30 = arith.addf %28, %29 : vector<4x128xf32>
    %c0_14 = arith.constant 0 : index
    %c0_15 = arith.constant 0 : index
    %31 = vector.load %arg3[%c0_14, %c0_15] : memref<4x2xf32, #tpu.memory_space<vmem>>, vector<4x1xf32>
    %c3 = arith.constant 3 : index
    %c0_16 = arith.constant 0 : index
    %32 = vector.load %arg2[%c3, %c0_16] : memref<8x128xf32, #tpu.memory_space<vmem>>, vector<1x128xf32>
    %33 = vector.broadcast %31 : vector<4x1xf32> to vector<4x128xf32>
    %34 = vector.broadcast %32 : vector<1x128xf32> to vector<4x128xf32>
    %35 = arith.mulf %33, %34 : vector<4x128xf32>
    %c0_17 = arith.constant 0 : index
    %c1 = arith.constant 1 : index
    %36 = vector.load %arg3[%c0_17, %c1] : memref<4x2xf32, #tpu.memory_space<vmem>>, vector<4x1xf32>
    %c4 = arith.constant 4 : index
    %c0_18 = arith.constant 0 : index
    %37 = vector.load %arg2[%c4, %c0_18] : memref<8x128xf32, #tpu.memory_space<vmem>>, vector<1x128xf32>
    %38 = vector.broadcast %36 : vector<4x1xf32> to vector<4x128xf32>
    %39 = vector.broadcast %37 : vector<1x128xf32> to vector<4x128xf32>
    %40 = arith.mulf %38, %39 : vector<4x128xf32>
    %41 = arith.addf %35, %40 : vector<4x128xf32>
    %cst_19 = arith.constant dense<0.000000e+00> : vector<4x128xf32>
    %42 = tpu.matmul %30, %1, %cst_19 {dimension_numbers = #tpu.dot_dimension_numbers<[1], [0], [0], [1], [0, 0, 1, 1], [], []>} : vector<4x128xf32>, vector<128x128xf32>, vector<4x128xf32> -> vector<4x128xf32>
    %43 = arith.addf %42, %41 : vector<4x128xf32>
    %c1_20 = arith.constant 1 : index
    %c0_21 = arith.constant 0 : index
    %44 = vector.load %arg2[%c1_20, %c0_21] : memref<8x128xf32, #tpu.memory_space<vmem>>, vector<1x128xf32>
    %45 = vector.broadcast %44 : vector<1x128xf32> to vector<4x128xf32>
    %46 = arith.addf %43, %45 : vector<4x128xf32>
    %cst_22 = arith.constant 5.000000e-01 : f32
    %47 = vector.broadcast %cst_22 : f32 to vector<4x128xf32>
    %48 = arith.mulf %47, %46 : vector<4x128xf32>
    %49 = math.tanh %48 : vector<4x128xf32>
    %cst_23 = arith.constant 5.000000e-01 : f32
    %50 = vector.broadcast %cst_23 : f32 to vector<4x128xf32>
    %51 = arith.mulf %50, %49 : vector<4x128xf32>
    %cst_24 = arith.constant 5.000000e-01 : f32
    %52 = vector.broadcast %cst_24 : f32 to vector<4x128xf32>
    %53 = arith.addf %51, %52 : vector<4x128xf32>
    %c2 = arith.constant 2 : index
    %c0_25 = arith.constant 0 : index
    %54 = vector.load %arg2[%c2, %c0_25] : memref<8x128xf32, #tpu.memory_space<vmem>>, vector<1x128xf32>
    %55 = vector.broadcast %54 : vector<1x128xf32> to vector<4x128xf32>
    %56 = arith.mulf %53, %55 : vector<4x128xf32>
    %cst_26 = arith.constant dense<0.000000e+00> : vector<4xf32>
    %57 = vector.multi_reduction <add>, %56, %cst_26 [1] : vector<4x128xf32> to vector<4xf32>
    %58 = vector.shape_cast %57 : vector<4xf32> to vector<4x1xf32>
    %c5 = arith.constant 5 : index
    %c0_27 = arith.constant 0 : index
    %59 = vector.load %arg2[%c5, %c0_27] : memref<8x128xf32, #tpu.memory_space<vmem>>, vector<1x1xf32>
    %60 = vector.broadcast %59 : vector<1x1xf32> to vector<4x1xf32>
    %61 = arith.addf %58, %60 : vector<4x1xf32>
    %cst_28 = arith.constant 5.000000e-01 : f32
    %62 = vector.broadcast %cst_28 : f32 to vector<4x1xf32>
    %63 = arith.mulf %62, %61 : vector<4x1xf32>
    %64 = math.tanh %63 : vector<4x1xf32>
    %cst_29 = arith.constant 5.000000e-01 : f32
    %65 = vector.broadcast %cst_29 : f32 to vector<4x1xf32>
    %66 = arith.mulf %65, %64 : vector<4x1xf32>
    %cst_30 = arith.constant 5.000000e-01 : f32
    %67 = vector.broadcast %cst_30 : f32 to vector<4x1xf32>
    %68 = arith.addf %66, %67 : vector<4x1xf32>
    %c0_31 = arith.constant 0 : index
    %c0_32 = arith.constant 0 : index
    %69 = vector.load %arg4[%c0_31, %c0_32] : memref<4x1xf32, #tpu.memory_space<vmem>>, vector<4x1xf32>
    tpu.vector_store %arg4[%c0_31, %c0_32], %68 {strides = array<i32>} : memref<4x1xf32, #tpu.memory_space<vmem>>, vector<4x1xf32>,
    return
  }
}

</mosaic_0001>

<bundles_post_ra>
// kernel: cdr_cnn_forward.1
= control target key start
LH: loop header
LB: loop body
LE: loop exit
PB: predicated region body
PF: predicated region fallthrough
CT: control target
= control target key end

     0   :  { %v945_v63 = vmov 0.0|0.0   ;;  %vm946_vm0 = vmmov 0   ;;  %s1403_s1 = inlined_call_operand.vmem [shape: f32[256,128], index: 1, kind: input, shape index: {}]   ;;  %s1404_s0 = inlined_call_operand.vmem [shape: f32[288,128], index: 0, kind: input, shape index: {}]   ;;  %s1405_s3 = inlined_call_operand.vmem [shape: f32[4,2], index: 3, kind: input, shape index: {}]   ;;  %s1406_s2 = inlined_call_operand.vmem [shape: f32[8,128], index: 2, kind: input, shape index: {}]   ;;  %s1407_s4 = inlined_call_operand.vmem [shape: f32[4,1], index: 4, kind: output, shape index: {}]  }
   0x1   :  { %v17_v0 = vld [vmem:[%s1403_s1] sm:$0xff]  ;;  %v18_v1 = vld [vmem:[%s1403_s1 + $0x8] sm:$0xff]  ;;  %v19_v2 = vld [vmem:[%s1403_s1 + $0x10] sm:$0xff] }
   0x2   :  { %v853_v3 = vpack.c.bf16 %v18_v1, %v17_v0  ;;  %v20_v4 = vld [vmem:[%s1403_s1 + $0x18] sm:$0xff]  ;;  %v21_v6 = vld [vmem:[%s1403_s1 + $0x20] sm:$0xff]  ;;  %v22_v7 = vld [vmem:[%s1403_s1 + $0x28] sm:$0xff] }
   0x3   :  { %v857_v5 = vpack.c.bf16 %v20_v4, %v19_v2  ;;  %v861_v8 = vpack.c.bf16 %v22_v7, %v21_v6  ;;  %v49_v9 = vld [vmem:[%s1404_s0] sm:$0xff]  ;;  %v23_v10 = vld [vmem:[%s1403_s1 + $0x30] sm:$0xff]  ;;  %v24_v11 = vld [vmem:[%s1403_s1 + $0x38] sm:$0xff] }
   0x4   :  { %854 = vmatprep.subr.bf16.mxu0 %v853_v3  ;;  %909 = vmatprep.subr.bf16.mxu1 %v853_v3  ;;  %v69_v12 = vld [vmem:[%s1404_s0 + $0xa0] sm:$0xff]  ;;  %v865_v13 = vpack.c.bf16 %v24_v11, %v23_v10  ;;  %v26_v15 = vld [vmem:[%s1403_s1 + $0x48] sm:$0xff]  ;;  %v27_v17 = vld [vmem:[%s1403_s1 + $0x50] sm:$0xff] }
   0x5   :  { %856 = vmatpush3.bf16.msra.mxu0 %v853_v3  ;;  %917 = vmatpush3.bf16.msra.mxu1 %v853_v3  ;;  %v25_v14 = vld [vmem:[%s1403_s1 + $0x40] sm:$0xff]  ;;  %v28_v18 = vld [vmem:[%s1403_s1 + $0x58] sm:$0xff]  ;;  %v30_v21 = vld [vmem:[%s1403_s1 + $0x68] sm:$0xff] }
   0x6   :  { %858 = vmatprep.subr.bf16.mxu0 %v857_v5  ;;  %910 = vmatprep.subr.bf16.mxu1 %v857_v5  ;;  %v869_v16 = vpack.c.bf16 %v26_v15, %v25_v14  ;;  %v873_v19 = vpack.c.bf16 %v28_v18, %v27_v17  ;;  %v29_v20 = vld [vmem:[%s1403_s1 + $0x60] sm:$0xff]  ;;  %v31_v23 = vld [vmem:[%s1403_s1 + $0x70] sm:$0xff]  ;;  %v32_v24 = vld [vmem:[%s1403_s1 + $0x78] sm:$0xff] }
   0x7   :  { %764 = vmatprep.mubr.f32.mxu0 %v49_v9  ;;  %794 = vmatprep.mubr.f32.mxu1 %v69_v12  ;;  %v877_v22 = vpack.c.bf16 %v30_v21, %v29_v20  ;;  %v881_v25 = vpack.c.bf16 %v32_v24, %v31_v23  ;;  %v50_v26 = vld [vmem:[%s1404_s0 + $0x8] sm:$0xff]  ;;  %v51_v28 = vld [vmem:[%s1404_s0 + $0x10] sm:$0xff]  ;;  %v52_v30 = vld [vmem:[%s1404_s0 + $0x18] sm:$0xff]  ;;  %v949_v24 = vmov 1  }
   0x8   :  { %v70_v27 = vld [vmem:[%s1404_s0 + $0xa8] sm:$0xff]  ;;  %v71_v29 = vld [vmem:[%s1404_s0 + $0xb0] sm:$0xff]  ;;  %v72_v31 = vld [vmem:[%s1404_s0 + $0xb8] sm:$0xff] }
   0x9   :  { %860 = vmatpush3.bf16.msra.mxu0 %v857_v5  ;;  %918 = vmatpush3.bf16.msra.mxu1 %v857_v5  ;;  %v53_v32 = vld [vmem:[%s1404_s0 + $0x20] sm:$0xff]  ;;  %v54_v34 = vld [vmem:[%s1404_s0 + $0x28] sm:$0xff]  ;;  %v55_v36 = vld [vmem:[%s1404_s0 + $0x30] sm:$0xff]  ;;  %v947_v5 = vmov 0.0  }
   0xa   :  { %862 = vmatprep.subr.bf16.mxu0 %v861_v8  ;;  %911 = vmatprep.subr.bf16.mxu1 %v861_v8  ;;  %v73_v33 = vld [vmem:[%s1404_s0 + $0xc0] sm:$0xff]  ;;  %v74_v35 = vld [vmem:[%s1404_s0 + $0xc8] sm:$0xff]  ;;  %v75_v37 = vld [vmem:[%s1404_s0 + $0xd0] sm:$0xff] }
   0xb   :  { %v56_v38 = vld [vmem:[%s1404_s0 + $0x38] sm:$0xff]  ;;  %v57_v40 = vld [vmem:[%s1404_s0 + $0x40] sm:$0xff]  ;;  %v58_v42 = vld [vmem:[%s1404_s0 + $0x48] sm:$0xff] }
   0xc   :  { %v76_v39 = vld [vmem:[%s1404_s0 + $0xd8] sm:$0xff]  ;;  %v77_v41 = vld [vmem:[%s1404_s0 + $0xe0] sm:$0xff]  ;;  %v78_v43 = vld [vmem:[%s1404_s0 + $0xe8] sm:$0xff] }
   0xd   :  { %864 = vmatpush3.bf16.msra.mxu0 %v861_v8  ;;  %919 = vmatpush3.bf16.msra.mxu1 %v861_v8  ;;  %v59_v44 = vld [vmem:[%s1404_s0 + $0x50] sm:$0xff]  ;;  %v60_v46 = vld [vmem:[%s1404_s0 + $0x58] sm:$0xff]  ;;  %v61_v48 = vld [vmem:[%s1404_s0 + $0x60] sm:$0xff] }
   0xe   :  { %866 = vmatprep.subr.bf16.mxu0 %v865_v13  ;;  %912 = vmatprep.subr.bf16.mxu1 %v865_v13  ;;  %v79_v45 = vld [vmem:[%s1404_s0 + $0xf0] sm:$0xff]  ;;  %v80_v47 = vld [vmem:[%s1404_s0 + $0xf8] sm:$0xff]  ;;  %v81_v49 = vld [vmem:[%s1404_s0 + $0x100] sm:$0xff] }
   0xf   :  { %v62_v50 = vld [vmem:[%s1404_s0 + $0x68] sm:$0xff]  ;;  %v63_v52 = vld [vmem:[%s1404_s0 + $0x70] sm:$0xff]  ;;  %v64_v54 = vld [vmem:[%s1404_s0 + $0x78] sm:$0xff] }
  0x10   :  { %v82_v51 = vld [vmem:[%s1404_s0 + $0x108] sm:$0xff]  ;;  %v83_v53 = vld [vmem:[%s1404_s0 + $0x110] sm:$0xff]  ;;  %v84_v55 = vld [vmem:[%s1404_s0 + $0x118] sm:$0xff] }
  0x11   :  { %868 = vmatpush3.bf16.msra.mxu0 %v865_v13  ;;  %920 = vmatpush3.bf16.msra.mxu1 %v865_v13  ;;  %v65_v56 = vld [vmem:[%s1404_s0 + $0x80] sm:$0xff]  ;;  %v66_v57 = vld [vmem:[%s1404_s0 + $0x88] sm:$0xff]  ;;  %v67_v58 = vld [vmem:[%s1404_s0 + $0x90] sm:$0xff] }
  0x12   :  { %870 = vmatprep.subr.bf16.mxu0 %v869_v16  ;;  %913 = vmatprep.subr.bf16.mxu1 %v869_v16  ;;  %v68_v59 = vld [vmem:[%s1404_s0 + $0x98] sm:$0xff]  ;;  %v33_v60 = vld [vmem:[%s1403_s1 + $0x80] sm:$0xff]  ;;  %v34_v61 = vld [vmem:[%s1403_s1 + $0x88] sm:$0xff] }
  0x13   :  { %v886_v62 = vpack.c.bf16 %v34_v61, %v33_v60  ;;  %v35_v0 = vld [vmem:[%s1403_s1 + $0x90] sm:$0xff]  ;;  %v36_v1 = vld [vmem:[%s1403_s1 + $0x98] sm:$0xff]  ;;  %v37_v3 = vld [vmem:[%s1403_s1 + $0xa0] sm:$0xff] }
  0x14   :  { %v889_v2 = vpack.c.bf16 %v36_v1, %v35_v0  ;;  %v38_v4 = vld [vmem:[%s1403_s1 + $0xa8] sm:$0xff]  ;;  %v39_v7 = vld [vmem:[%s1403_s1 + $0xb0] sm:$0xff]  ;;  %v40_v8 = vld [vmem:[%s1403_s1 + $0xb8] sm:$0xff] }
  0x15   :  { %872 = vmatpush3.bf16.msra.mxu0 %v869_v16  ;;  %921 = vmatpush3.bf16.msra.mxu1 %v869_v16  ;;  %v892_v6 = vpack.c.bf16 %v38_v4, %v37_v3  ;;  %v895_v9 = vpack.c.bf16 %v40_v8, %v39_v7  ;;  %v41_v10 = vld [vmem:[%s1403_s1 + $0xc0] sm:$0xff]  ;;  %v42_v11 = vld [vmem:[%s1403_s1 + $0xc8] sm:$0xff]  ;;  %v43_v13 = vld [vmem:[%s1403_s1 + $0xd0] sm:$0xff] }
  0x16   :  { %874 = vmatprep.subr.bf16.mxu0 %v873_v19  ;;  %914 = vmatprep.subr.bf16.mxu1 %v873_v19  ;;  %v898_v12 = vpack.c.bf16 %v42_v11, %v41_v10  ;;  %v44_v14 = vld [vmem:[%s1403_s1 + $0xd8] sm:$0xff]  ;;  %v45_v16 = vld [vmem:[%s1403_s1 + $0xe0] sm:$0xff]  ;;  %v46_v17 = vld [vmem:[%s1403_s1 + $0xe8] sm:$0xff] }
  0x17   :  { %v901_v15 = vpack.c.bf16 %v44_v14, %v43_v13  ;;  %v904_v18 = vpack.c.bf16 %v46_v17, %v45_v16  ;;  %v48_v20 = vld [vmem:[%s1403_s1 + $0xf8] sm:$0xff]  ;;  %v512_v23 = vld [vmem:[%s1405_s3] sm:$0xf] }
  0x19   :  { %876 = vmatpush3.bf16.msra.mxu0 %v873_v19  ;;  %922 = vmatpush3.bf16.msra.mxu1 %v873_v19  ;;  %v47_v19 = vld [vmem:[%s1403_s1 + $0xf0] sm:$0xff] }
  0x1a   :  { %878 = vmatprep.subr.bf16.mxu0 %v877_v22  ;;  %915 = vmatprep.subr.bf16.mxu1 %v877_v22  ;;  %v907_v21 = vpack.c.bf16 %v48_v20, %v47_v19 }
  0x1d   :  { %880 = vmatpush3.bf16.msra.mxu0 %v877_v22  ;;  %923 = vmatpush3.bf16.msra.mxu1 %v877_v22  ;;  %v948_v22 = vmov 0  }
  0x1e   :  { %882 = vmatprep.subr.bf16.mxu0 %v881_v25  ;;  %916 = vmatprep.subr.bf16.mxu1 %v881_v25 }
  0x1f   :  { %931 = vset.pattern.permute.xlu0 %v948_v22 }
  0x20   :  { %516 = vperm.xlu0 %931, %v512_v23  }
  0x21   :  { %884 = vmatpush3.bf16.msra.mxu0 %v881_v25  ;;  %924 = vmatpush3.bf16.msra.mxu1 %v881_v25  ;;  %v330_v25 = vlaneseq }
  0x22   :  { %885 = vmatprep.subr.bf16.mxu1 %v945_v63 }
  0x24   :  { %765 = vmatmul.mubr.f32.vlgmr.msra.gmra.mrb[0].mxu0 %v50_v26  ;;  %795 = vmatmul.mubr.f32.vlgmr.msra.gmra.mrb[0].mxu1 %v70_v27  ;;  %v331_v26 = vshrl.u32 %v330_v25, 7 }
  0x25   :  { %767 = vmatprep.mubr.f32.mxu0 %v51_v28  ;;  %797 = vmatprep.mubr.f32.mxu1 %v71_v29  ;;  %v1186_v29 = vld [vmem:[%s1406_s2 + $0x6] ss:$0 sm:$0xff] }
  0x26   :  { %887 = vmatpush3.bf16.msra.mxu1 %v886_v62  ;;  %932 = vset.pattern.permute.xlu0 %v949_v24  ;;  %v332_v27 = vadd.s32 8, %v331_v26 }
  0x27   :  { %888 = vmatprep.subr.bf16.mxu1 %v945_v63  ;;  %526 = vperm.xlu0 %932, %v512_v23  }
  0x28   :  { %768 = vmatmul.mubr.f32.gmra.mrb[2].mxu0 %v52_v30  ;;  %798 = vmatmul.mubr.f32.gmra.mrb[2].mxu1 %v72_v31  ;;  %v341_v28 = vcvt.s32.f32 %v332_v27  ;;  %v1191_v30 = vld [vmem:[%s1406_s2 + $0x7] ss:$0 sm:$0xff]  ;;  %v340_v31 = vcvt.s32.f32 %v331_v26 }
  0x29   :  { %770 = vmatprep.mubr.f32.mxu0 %v53_v32  ;;  %800 = vmatprep.mubr.f32.mxu1 %v73_v33  ;;  %v333_v32 = vadd.s32 16, %v331_v26 }
  0x2a   :  { %890 = vmatpush3.bf16.msra.mxu1 %v889_v2  ;;  %vm1194_vm1 = vcmp.ge.f32.partialorder %v341_v28, %v1186_v29  ;;  %vm1199_vm2 = vcmp.lt.f32.partialorder %v341_v28, %v1191_v30  ;;  %vm355_vm3 = vcmp.ge.f32.partialorder %v340_v31, %v1186_v29  ;;  %vm368_vm4 = vcmp.lt.f32.partialorder %v340_v31, %v1191_v30 }
  0x2b   :  { %891 = vmatprep.subr.bf16.mxu1 %v945_v63  ;;  %vm378_vm5 = vmand %vm1194_vm1, %vm1199_vm2 }
  0x2c   :  { %771 = vmatmul.mubr.f32.gmra.mrb[4].mxu0 %v54_v34  ;;  %801 = vmatmul.mubr.f32.gmra.mrb[4].mxu1 %v74_v35  ;;  %v334_v35 = vadd.s32 24, %v331_v26  ;;  %vm377_vm6 = vmand %vm355_vm3, %vm368_vm4 }
  0x2d   :  { %773 = vmatprep.mubr.f32.mxu0 %v55_v36  ;;  %803 = vmatprep.mubr.f32.mxu1 %v75_v37  ;;  %v335_v36 = vadd.s32 32, %v331_v26  ;;  %v342_v37 = vcvt.s32.f32 %v333_v32 }
  0x2e   :  { %893 = vmatpush3.bf16.msra.mxu1 %v892_v6 }
  0x2f   :  { %894 = vmatprep.subr.bf16.mxu1 %v945_v63  ;;  %vm1210_vm7 = vcmp.ge.f32.partialorder %v342_v37, %v1186_v29  ;;  %vm1215_vm8 = vcmp.lt.f32.partialorder %v342_v37, %v1191_v30 }
  0x30   :  { %774 = vmatmul.mubr.f32.gmra.mrb[6].mxu0 %v56_v38  ;;  %804 = vmatmul.mubr.f32.gmra.mrb[6].mxu1 %v76_v39  ;;  %v343_v38 = vcvt.s32.f32 %v334_v35  ;;  %v336_v39 = vadd.s32 40, %v331_v26  ;;  %vm379_vm11 = vmand %vm1210_vm7, %vm1215_vm8 }
  0x31   :  { %776 = vmatprep.mubr.f32.mxu0 %v57_v40  ;;  %806 = vmatprep.mubr.f32.mxu1 %v77_v41  ;;  %v344_v40 = vcvt.s32.f32 %v335_v36 }
  0x32   :  { %896 = vmatpush3.bf16.msra.mxu1 %v895_v9  ;;  %vm1224_vm9 = vcmp.ge.f32.partialorder %v343_v38, %v1186_v29  ;;  %vm1229_vm10 = vcmp.lt.f32.partialorder %v343_v38, %v1191_v30 }
  0x33   :  { %897 = vmatprep.subr.bf16.mxu1 %v945_v63  ;;  %vm1238_vm12 = vcmp.ge.f32.partialorder %v344_v40, %v1186_v29  ;;  %vm1246_vm13 = vcmp.lt.f32.partialorder %v344_v40, %v1191_v30  ;;  %vm380_vm14 = vmand %vm1224_vm9, %vm1229_vm10 }
  0x34   :  { %777 = vmatmul.mubr.f32.gmra.mrb[8].mxu0 %v58_v42  ;;  %807 = vmatmul.mubr.f32.gmra.mrb[8].mxu1 %v78_v43  ;;  %v337_v43 = vadd.s32 48, %v331_v26  ;;  %vm381_vm1 = vmand %vm1238_vm12, %vm1246_vm13  ;;  %vm540_vm12 = vcmask 1041409   ;;  %vm543_vm13 = vcmask 1042434  }
  0x35   :  { %779 = vmatprep.mubr.f32.mxu0 %v59_v44  ;;  %809 = vmatprep.mubr.f32.mxu1 %v79_v45  ;;  %v950_v44 = vmov -1e+30  }
  0x36   :  { %899 = vmatpush3.bf16.msra.mxu1 %v898_v12  ;;  %v1219_v45 = vsel %vm378_vm5, 0.0, %v950_v44  ;;  %v1257_v61 = vsel %vm379_vm11, 0.0, %v950_v44  ;;  %v1275_v4 = vsel %vm380_vm14, 0.0, %v950_v44  ;;  %v1294_v11 = vsel %vm381_vm1, 0.0, %v950_v44 }
  0x37   :  { %900 = vmatprep.subr.bf16.mxu1 %v945_v63  ;;  %vm546_vm14 = vcmask 1043459  }
  0x38   :  { %780 = vmatmul.mubr.f32.gmra.mrb[10].mxu0 %v60_v46  ;;  %810 = vmatmul.mubr.f32.gmra.mrb[10].mxu1 %v80_v47  ;;  %v1221_v46 = vsel %vm377_vm6, 0.0, %v950_v44 }
  0x39   :  { %782 = vmatprep.mubr.f32.mxu0 %v61_v48  ;;  %812 = vmatprep.mubr.f32.mxu1 %v81_v49  ;;  %v345_v49 = vcvt.s32.f32 %v336_v39 }
  0x3a   :  { %902 = vmatpush3.bf16.msra.mxu1 %v901_v15 }
  0x3b   :  { %903 = vmatprep.subr.bf16.mxu1 %v945_v63  ;;  %vm1260_vm15 = vcmp.ge.f32.partialorder %v345_v49, %v1186_v29 }
  0x3c   :  { %783 = vmatmul.mubr.f32.gmra.mrb[12].mxu0 %v62_v50  ;;  %813 = vmatmul.mubr.f32.gmra.mrb[12].mxu1 %v82_v51  ;;  %v338_v50 = vadd.s32 56, %v331_v26 }
  0x3d   :  { %785 = vmatprep.mubr.f32.mxu0 %v63_v52  ;;  %815 = vmatprep.mubr.f32.mxu1 %v83_v53 }
  0x3e   :  { %905 = vmatpush3.bf16.msra.mxu1 %v904_v18  ;;  %v347_v0 = vcvt.s32.f32 %v338_v50 }
  0x3f   :  { %906 = vmatprep.subr.bf16.mxu1 %v945_v63 }
  0x40   :  { %786 = vmatmul.mubr.f32.gmra.mrb[14].mxu0 %v64_v54  ;;  %816 = vmatmul.mubr.f32.gmra.mrb[14].mxu1 %v84_v55  ;;  %vm1297_vm5 = vcmp.ge.f32.partialorder %v347_v0, %v1186_v29  ;;  %vm1302_vm6 = vcmp.lt.f32.partialorder %v347_v0, %v1191_v30 }
  0x41   :  { %788 = vmatprep.mubr.f32.mxu0 %v65_v56  ;;  %850 = vmatprep.mubr.msk.f32.mxu1 %vm946_vm0, %v947_v5  ;;  %vm1265_vm0 = vcmp.lt.f32.partialorder %v345_v49, %v1191_v30  ;;  %vm384_vm10 = vmand %vm1297_vm5, %vm1302_vm6 }
  0x42   :  { %908 = vmatpush3.bf16.msra.mxu1 %v907_v21  ;;  %vm382_vm4 = vmand %vm1260_vm15, %vm1265_vm0  ;;  %vm635_vm15 = vcmask 1043456   ;;  %vm649_vm0 = vcmask 3072  }
  0x43   :  { %v1313_v18 = vsel %vm382_vm4, 0.0, %v950_v44 }
  0x44   :  { %789 = vmatmul.mubr.f32.gmra.mrb[16].mxu0 %v66_v57  ;;  %v346_v57 = vcvt.s32.f32 %v337_v43 }
  0x45   :  { %791 = vmatprep.mubr.f32.mxu0 %v67_v58  ;;  %v339_v58 = vadd.s32 64, %v331_v26 }
  0x46   :  { %vm1278_vm2 = vcmp.ge.f32.partialorder %v346_v57, %v1186_v29  ;;  %vm1283_vm3 = vcmp.lt.f32.partialorder %v346_v57, %v1191_v30 }
  0x47   :  { %v348_v8 = vcvt.s32.f32 %v339_v58  ;;  %vm383_vm7 = vmand %vm1278_vm2, %vm1283_vm3 }
  0x48   :  { %792 = vmatmul.mubr.f32.gmra.mrb[18].mxu0 %v68_v59  ;;  %v1332_v25 = vsel %vm383_vm7, 0.0, %v950_v44 }
  0x49   :  { %vm1316_vm8 = vcmp.ge.f32.partialorder %v348_v8, %v1186_v29  ;;  %vm1321_vm9 = vcmp.lt.f32.partialorder %v348_v8, %v1191_v30  ;;  %v1339_v30 = vsel %vm384_vm10, 0.0, %v950_v44 }
  0x4a   :  { %vm385_vm11 = vmand %vm1316_vm8, %vm1321_vm9 }
  0x4b   :  { %v1344_v35 = vsel %vm385_vm11, 0.0, %v950_v44 }
  0xf7   :  { %v766_v51 = vpop.f32.mrb[0].mxu0  ;;  %v1242_v53 = vpop.f32.mrb[0].mxu1 }
  0xf8   :  { %v396_v54 = vadd.f32 %v766_v51, %v1219_v45  ;;  %v151_v55 = vpop.f32.mrb[1].mxu0  ;;  %v1250_v59 = vpop.f32.mrb[1].mxu1 }
  0xf9   :  { %v395_v60 = vadd.f32 %v1221_v46, %v151_v55 }
  0xfb   :  { %v431_v1 = vmax.f32 %v395_v60, %v396_v54  ;;  %v769_v2 = vpop.f32.mrb[2].mxu0  ;;  %v1273_v3 = vpop.f32.mrb[2].mxu1 }
  0xfc   :  { %v161_v5 = vpop.f32.mrb[3].mxu0  ;;  %v1287_v9 = vpop.f32.mrb[3].mxu1  ;;  %v398_v14 = vadd.f32 %v769_v2, %v1275_v4 }
  0xfd   :  { %v397_v10 = vadd.f32 %v1257_v61, %v161_v5 }
  0xff   :  { %v432_v15 = vmax.f32 %v431_v1, %v397_v10  ;;  %v772_v16 = vpop.f32.mrb[4].mxu0  ;;  %v1311_v17 = vpop.f32.mrb[4].mxu1 }
 0x100   :  { %v171_v19 = vpop.f32.mrb[5].mxu0  ;;  %v1325_v22 = vpop.f32.mrb[5].mxu1  ;;  %v400_v26 = vadd.f32 %v772_v16, %v1313_v18 }
 0x101   :  { %v399_v23 = vadd.f32 %v1294_v11, %v171_v19  ;;  %v433_v24 = vmax.f32 %v432_v15, %v398_v14 }
 0x103   :  { %v434_v27 = vmax.f32 %v433_v24, %v399_v23  ;;  %v775_v28 = vpop.f32.mrb[6].mxu0  ;;  %v805_v29 = vpop.f32.mrb[6].mxu1 }
 0x104   :  { %v181_v31 = vpop.f32.mrb[7].mxu0  ;;  %v1341_v32 = vpop.f32.mrb[7].mxu1  ;;  %v402_v36 = vadd.f32 %v775_v28, %v1339_v30  ;;  %v422_v39 = vadd.f32 %v805_v29, %v1221_v46 }
 0x105   :  { %v401_v33 = vadd.f32 %v1332_v25, %v181_v31  ;;  %v435_v34 = vmax.f32 %v434_v27, %v400_v26 }
 0x107   :  { %v436_v37 = vmax.f32 %v435_v34, %v401_v33  ;;  %v778_v38 = vpop.f32.mrb[8].mxu0  ;;  %v808_v40 = vpop.f32.mrb[8].mxu1 }
 0x108   :  { %v191_v41 = vpop.f32.mrb[9].mxu0  ;;  %v291_v42 = vpop.f32.mrb[9].mxu1  ;;  %v424_v48 = vadd.f32 %v808_v40, %v1257_v61  ;;  %v404_v54 = vadd.f32 %v778_v38, %v1221_v46 }
 0x109   :  { %v403_v43 = vadd.f32 %v1344_v35, %v191_v41  ;;  %v437_v47 = vmax.f32 %v436_v37, %v402_v36  ;;  %v423_v49 = vadd.f32 %v1219_v45, %v291_v42 }
 0x10b   :  { %v438_v50 = vmax.f32 %v437_v47, %v403_v43  ;;  %v781_v51 = vpop.f32.mrb[10].mxu0  ;;  %v473_v44 = vmax.f32 %v422_v39, %v423_v49  ;;  %v811_v52 = vpop.f32.mrb[10].mxu1 }
 0x10c   :  { %v201_v55 = vpop.f32.mrb[11].mxu0  ;;  %v301_v56 = vpop.f32.mrb[11].mxu1  ;;  %v426_v63 = vadd.f32 %v811_v52, %v1294_v11  ;;  %v406_v0 = vadd.f32 %v781_v51, %v1257_v61 }
 0x10d   :  { %v439_v57 = vrot.slane %v438_v50, 4  ;;  %v405_v58 = vadd.f32 %v1219_v45, %v201_v55  ;;  %v425_v60 = vadd.f32 %v1275_v4, %v301_v56  ;;  %v474_v62 = vmax.f32 %v473_v44, %v424_v48 }
 0x10f   :  { %v445_v1 = vmax.f32 %v404_v54, %v405_v58  ;;  %v784_v2 = vpop.f32.mrb[12].mxu0  ;;  %v475_v5 = vmax.f32 %v474_v62, %v425_v60  ;;  %v814_v6 = vpop.f32.mrb[12].mxu1  ;;  %v440_v10 = vmax.f32 %v438_v50, %v439_v57  ;;  %v415_v60 = vadd.f32 %v1257_v61, %v1250_v59 }
 0x110   :  { %v211_v7 = vpop.f32.mrb[13].mxu0  ;;  %v311_v8 = vpop.f32.mrb[13].mxu1  ;;  %v428_v15 = vadd.f32 %v814_v6, %v1332_v25  ;;  %v408_v19 = vadd.f32 %v784_v2, %v1294_v11  ;;  %v418_v59 = vadd.f32 %v1273_v3, %v1313_v18 }
 0x111   :  { %v407_v12 = vadd.f32 %v1275_v4, %v211_v7  ;;  %v446_v13 = vmax.f32 %v445_v1, %v406_v0  ;;  %v427_v14 = vadd.f32 %v1313_v18, %v311_v8  ;;  %v476_v16 = vmax.f32 %v475_v5, %v426_v63 }
 0x112   :  { %v441_v28 = vrot.slane %v440_v10, 2  ;;  %v416_v1 = vadd.f32 %v1242_v53, %v1275_v4  ;;  %v419_v53 = vadd.f32 %v1332_v25, %v1325_v22 }
 0x113   :  { %v447_v20 = vmax.f32 %v446_v13, %v407_v12  ;;  %v787_v21 = vpop.f32.mrb[14].mxu0  ;;  %v817_v23 = vpop.f32.mrb[14].mxu1  ;;  %v477_v26 = vmax.f32 %v476_v16, %v427_v14  ;;  %v420_v16 = vadd.f32 %v1311_v17, %v1339_v30 }
 0x114   :  { %v221_v24 = vpop.f32.mrb[15].mxu0  ;;  %v321_v27 = vpop.f32.mrb[15].mxu1  ;;  %v430_v34 = vadd.f32 %v817_v23, %v1344_v35  ;;  %v410_v37 = vadd.f32 %v787_v21, %v1332_v25  ;;  %v442_v42 = vmax.f32 %v440_v10, %v441_v28 }
 0x115   :  { %v409_v29 = vadd.f32 %v1313_v18, %v221_v24  ;;  %v448_v31 = vmax.f32 %v447_v20, %v408_v19  ;;  %v429_v33 = vadd.f32 %v1339_v30, %v321_v27  ;;  %v478_v36 = vmax.f32 %v477_v26, %v428_v15 }
 0x116   :  { %v443_v55 = vrot.slane %v442_v42, 1  ;;  %v421_v20 = vadd.f32 %v1344_v35, %v1341_v32 }
 0x117   :  { %v449_v38 = vmax.f32 %v448_v31, %v409_v29  ;;  %v790_v39 = vpop.f32.mrb[16].mxu0  ;;  %v479_v41 = vmax.f32 %v478_v36, %v429_v33 }
 0x118   :  { %v231_v40 = vpop.f32.mrb[17].mxu0  ;;  %v412_v49 = vadd.f32 %v790_v39, %v1344_v35  ;;  %v444_v0 = vmax.f32 %v442_v42, %v443_v55  ;;  %v658_v55 = vld [vmem:[%s1406_s2 + $0x3] ss:$0 sm:$0xff] }
 0x119   :  { %v411_v43 = vadd.f32 %v1339_v30, %v231_v40  ;;  %v450_v47 = vmax.f32 %v449_v38, %v410_v37  ;;  %v480_v48 = vmax.f32 %v479_v41, %v430_v34 }
 0x11b   :  { %v451_v50 = vmax.f32 %v450_v47, %v411_v43  ;;  %v793_v51 = vpop.f32.mrb[18].mxu0  ;;  %v481_v54 = vrot.slane %v480_v48, 4 }
 0x11c   :  { %v414_v44 = vadd.f32 %v793_v51, %v1219_v45  ;;  %v241_v52 = vpop.f32.mrb[19].mxu0  ;;  %v657_v45 = vld [vmem:[%s1406_s2] ss:$0 sm:$0xff] }
 0x11d   :  { %v452_v56 = vmax.f32 %v451_v50, %v412_v49  ;;  %v413_v57 = vadd.f32 %v1221_v46, %v241_v52  ;;  %v482_v58 = vmax.f32 %v480_v48, %v481_v54  ;;  %v417_v46 = vadd.f32 %v1294_v11, %v1287_v9  ;;  %v517_v54 = vpop.permute.xlu0 %516 }
 0x11e   :  { %v492_v10 = vadd.f32 %v657_v45, %v444_v0  ;;  %v660_v0 = vld [vmem:[%s1406_s2 + $0x1] ss:$0 sm:$0xff] }
 0x11f   :  { %v453_v62 = vrot.slane %v452_v56, 4  ;;  %v459_v63 = vmax.f32 %v413_v57, %v414_v44  ;;  %v483_v6 = vrot.slane %v482_v58, 2  ;;  %v659_v57 = vld [vmem:[%s1406_s2 + $0x4] ss:$0 sm:$0xff] }
 0x120   :  { %v496_v15 = vmul.f32 0.5, %v492_v10 }
 0x121   :  { %v454_v2 = vmax.f32 %v452_v56, %v453_v62  ;;  %v460_v5 = vmax.f32 %v459_v63, %v415_v60  ;;  %v484_v13 = vmax.f32 %v482_v58, %v483_v6  ;;  %v527_v56 = vpop.permute.xlu0 %526  ;;  %v523_v58 = vmul.f32 %v658_v55, %v517_v54 }
 0x122   :  { %933 = vtanh.f32 %v496_v15  ;;  %v533_v60 = vmul.f32 %v659_v57, %v527_v56 }
 0x123   :  { %v455_v7 = vrot.slane %v454_v2, 2  ;;  %v461_v8 = vmax.f32 %v460_v5, %v416_v1  ;;  %v485_v11 = vrot.slane %v484_v13, 1 }
 0x124   :  { %v534_v62 = vadd.f32 %v533_v60, %v523_v58 }
 0x125   :  { %v456_v61 = vmax.f32 %v454_v2, %v455_v7  ;;  %v462_v12 = vmax.f32 %v461_v8, %v417_v46  ;;  %v486_v24 = vmax.f32 %v484_v13, %v485_v11  ;;  %v661_v7 = vld [vmem:[%s1406_s2 + $0x2] ss:$0 sm:$0xff] }
 0x127   :  { %v457_v4 = vrot.slane %v456_v61, 1  ;;  %v463_v14 = vmax.f32 %v462_v12, %v418_v59  ;;  %v495_v26 = vadd.f32 %v657_v45, %v486_v24 }
 0x129   :  { %v458_v19 = vmax.f32 %v456_v61, %v457_v4  ;;  %v464_v9 = vmax.f32 %v463_v14, %v419_v53  ;;  %v499_v29 = vmul.f32 0.5, %v495_v26  ;;  %v662_v61 = vld [vmem:[%s1406_s2 + $0x5] ss:$0 sm:$0xff] }
 0x12b   :  { %v493_v21 = vadd.f32 %v657_v45, %v458_v19  ;;  %v465_v3 = vmax.f32 %v464_v9, %v420_v16 }
 0x12c   :  { %v934_v17 = vpop.eup %933 }
 0x12d   :  { %v497_v18 = vmul.f32 0.5, %v493_v21  ;;  %v466_v23 = vmax.f32 %v465_v3, %v421_v20  ;;  %v504_v34 = vmul.f32 0.5, %v934_v17 }
 0x12f   :  { %935 = vtanh.f32 %v497_v18  ;;  %v467_v22 = vrot.slane %v466_v23, 4  ;;  %v508_v38 = vadd.f32 0.5, %v504_v34 }
 0x130   :  { %937 = vtanh.f32 %v499_v29 }
 0x131   :  { %v468_v25 = vmax.f32 %v466_v23, %v467_v22 }
 0x133   :  { %v469_v27 = vrot.slane %v468_v25, 2 }
 0x135   :  { %v470_v28 = vmax.f32 %v468_v25, %v469_v27 }
 0x137   :  { %v471_v30 = vrot.slane %v470_v28, 1 }
 0x139   :  { %v936_v31 = vpop.eup %935  ;;  %v472_v33 = vmax.f32 %v470_v28, %v471_v30 }
 0x13a   :  { %v505_v32 = vmul.f32 0.5, %v936_v31  ;;  %v938_v41 = vpop.eup %937 }
 0x13b   :  { %v494_v35 = vadd.f32 %v657_v45, %v472_v33  ;;  %v507_v42 = vmul.f32 0.5, %v938_v41 }
 0x13c   :  { %v509_v36 = vadd.f32 0.5, %v505_v32 }
 0x13d   :  { %v498_v37 = vmul.f32 0.5, %v494_v35  ;;  %v511_v48 = vadd.f32 0.5, %v507_v42 }
 0x13e   :  { %v539_v39 = vrot.slane %v509_v36, 7 }
 0x13f   :  { %939 = vtanh.f32 %v498_v37  ;;  %v545_v51 = vrot.slane %v511_v48, 5 }
 0x140   :  { %v541_v40 = vsel %vm540_vm12, %v539_v39, %v508_v38 }
 0x149   :  { %v940_v43 = vpop.eup %939 }
 0x14a   :  { %v506_v47 = vmul.f32 0.5, %v940_v43 }
 0x14c   :  { %v510_v49 = vadd.f32 0.5, %v506_v47 }
 0x14e   :  { %v542_v50 = vrot.slane %v510_v49, 6 }
 0x150   :  { %v544_v44 = vsel %vm543_vm13, %v542_v50, %v541_v40 }
 0x151   :  { %v547_v52 = vsel %vm546_vm14, %v545_v51, %v544_v44 }
 0x152   :  { %851 = vmatmul.mubr.f32.vlgmr.msra.gmra.mrb[16].mxu1 %v547_v52 }
 0x225   :  { %v615_v63 = vpop.f32.mrb[16].mxu1 }
 0x226   :  { %v616_v1 = vadd.f32 %v615_v63, %v534_v62  ;;  %v852_v2 = vpop.f32.mrb[17].mxu1 }
 0x228   :  { %v624_v5 = vadd.f32 %v660_v0, %v616_v1 }
 0x22a   :  { %v625_v45 = vmul.f32 0.5, %v624_v5 }
 0x22c   :  { %941 = vtanh.f32 %v625_v45 }
 0x236   :  { %v942_v6 = vpop.eup %941 }
 0x237   :  { %v627_v46 = vmul.f32 0.5, %v942_v6 }
 0x239   :  { %v628_v8 = vadd.f32 0.5, %v627_v46 }
 0x23b   :  { %v634_v10 = vmul.f32 %v661_v7, %v628_v8 }
 0x23d   :  { %v636_v59 = vsel %vm635_vm15, %v634_v10, 0.0 }
 0x23e   :  { %637 = vadd.xlane.f32.xlu1 %v636_v59 }
 0x2cb   :  { %v638_v12 = vpop.xlane.xlu1 %637 }
 0x2cc   :  { %v644_v13 = vadd.f32 %v662_v61, %v638_v12 }
 0x2ce   :  { %v645_v53 = vmul.f32 0.5, %v644_v13 }
 0x2d0   :  { %943 = vtanh.f32 %v645_v53 }
 0x2da   :  { %v944_v4 = vpop.eup %943 }
 0x2db   :  { %v647_v14 = vmul.f32 0.5, %v944_v4 }
 0x2dd   :  { %v648_v15 = vadd.f32 0.5, %v647_v14 }
 0x2df   :  { %650 = vst.msk [vmem:[%s1407_s4] sm:$0xf] %vm649_vm0, %v648_v15 }

</bundles_post_ra>
